<compile_context>
chip_gen: v7x
topology: tpu7x:2x2x1
jax: 0.10.0
libtpu: 0.0.40
codegen_flags: <defaults>
</compile_context>

<pallas_src>
import functools
import math

import jax
import jax.numpy as jnp
from jax.experimental import pallas as pl
from jax.experimental.pallas import tpu as pltpu


def _round_up(n, m):
    return ((n + m - 1) // m) * m


# ---------------------------------------------------------------------------
# Fused Pallas kernel: full MLP for one batch tile
# ---------------------------------------------------------------------------
def _fnn_fused_kernel(x_ref, w_in_ref, b_in_ref, w_hid_ref, b_hid_ref,
                      w_out_ref, b_out_ref, logits_ref, hidden_ref,
                      *, n_hidden: int, w_pad: int):
    """One batch tile of the full MLP.

    x_ref:      (TB, K)            f32 (raw flattened input rows)
    w_in_ref:   (K, W_pad)         bf16
    b_in_ref:   (1, W_pad)         f32
    w_hid_ref:  (L, W_pad, W_pad)  bf16   (fcs..., fc_embeddings)
    b_hid_ref:  (L, 1, W_pad)      f32
    w_out_ref:  (W_pad, C_pad)     bf16
    b_out_ref:  (1, C_pad)         f32
    logits_ref: (TB, C_pad)        f32
    hidden_ref: (TB, L * W_pad)    bf16   (contiguous lane-dense slab)
    """
    cdt = w_in_ref.dtype

    # fc_in + ReLU.  x arrives straight from HBM as f32; cast on-chip.  The
    # contraction dim (784) is not a multiple of 128 -- Mosaic zero-pads the
    # matmul operands internally, so no wrapper-side K padding is needed.
    x = x_ref[...].astype(cdt)
    h = jnp.dot(x, w_in_ref[...], preferred_element_type=jnp.float32)
    h = jnp.maximum(h + b_in_ref[...], 0.0).astype(cdt)

    # Hidden stack (fcs..., fc_embeddings), all ReLU.  Bias-add/ReLU in f32 on
    # top of the f32 MXU accumulator; one bf16 cast per layer serves both the
    # slab writeback and the next matmul's LHS.
    for i in range(n_hidden):
        y = jnp.dot(h, w_hid_ref[i], preferred_element_type=jnp.float32)
        h = jnp.maximum(y + b_hid_ref[i], 0.0).astype(cdt)
        hidden_ref[:, i * w_pad:(i + 1) * w_pad] = h

    # fc_classifier (no ReLU); logits kept in f32.
    logits = jnp.dot(h, w_out_ref[...],
                     preferred_element_type=jnp.float32) + b_out_ref[...]
    logits_ref[...] = logits.astype(logits_ref.dtype)


# ---------------------------------------------------------------------------
# Batch-tile selection: big tiles, >= 2 grid steps when the batch allows it
# ---------------------------------------------------------------------------
def _choose_batch_tiling(B, max_tile=1024):
    """Returns (TB, B_pad, nb)."""
    B8 = _round_up(B, 8)
    if B8 <= 8:
        return B8, B8, 1
    # Split into >= 2 steps so both v7x TensorCores get work, while keeping
    # tiles large (up to max_tile rows) to amortize per-step overhead and make
    # the HBM DMAs long and contiguous.
    TB = min(max_tile, _round_up((B8 + 1) // 2, 8))
    B_pad = _round_up(B, TB)
    return TB, B_pad, B_pad // TB


# ---------------------------------------------------------------------------
# Wrapper: one pallas_call, slice real rows/lanes back out
# ---------------------------------------------------------------------------
def fnn_forward_fused(params, x, *, width, num_classes,
                      compute_dtype=jnp.bfloat16, max_batch_tile=1024):
    """Replicates FNN.forward: returns (logits, list_of_hidden_activations)."""
    B = x.shape[0]
    x2d = x.reshape(B, -1)                      # torch.flatten(x, 1) -- no copy
    K = x2d.shape[1]

    W_pad = _round_up(max(width, 128), 128)
    C_pad = _round_up(max(num_classes, 128), 128)
    TB, B_pad, nb = _choose_batch_tiling(B, max_batch_tile)

    w_in, b_in = params["fc_in"]
    hidden_layers = list(params["fcs"]) + [params["fc_embeddings"]]
    w_out, b_out = params["fc_classifier"]
    L = len(hidden_layers)                      # = depth - 1

    def pad2(a, rows, cols):
        return jnp.pad(a, ((0, rows - a.shape[0]), (0, cols - a.shape[1])))

    # Zero padding is exact: padded weight rows/cols and bias lanes stay zero
    # through the ReLU stack, so the real `width` / `num_classes` lanes are
    # unchanged; padded batch rows are sliced off below.
    x_p = x2d.astype(jnp.float32)
    if B_pad != B:
        x_p = jnp.pad(x_p, ((0, B_pad - B), (0, 0)))       # batch pad only
    w_in_p = pad2(w_in, K, W_pad).astype(compute_dtype)
    b_in_p = pad2(b_in.reshape(1, -1), 1, W_pad).astype(jnp.float32)
    w_hid_p = jnp.stack(
        [pad2(w, W_pad, W_pad) for (w, _) in hidden_layers]).astype(compute_dtype)
    b_hid_p = jnp.stack(
        [pad2(b.reshape(1, -1), 1, W_pad) for (_, b) in hidden_layers]
    ).astype(jnp.float32)
    w_out_p = pad2(w_out, W_pad, C_pad).astype(compute_dtype)
    b_out_p = pad2(b_out.reshape(1, -1), 1, C_pad).astype(jnp.float32)

    kernel = functools.partial(_fnn_fused_kernel, n_hidden=L, w_pad=W_pad)

    logits_p, hidden_p = pl.pallas_call(
        kernel,
        grid=(nb,),
        out_shape=(
            jax.ShapeDtypeStruct((B_pad, C_pad), jnp.float32),
            jax.ShapeDtypeStruct((B_pad, L * W_pad), compute_dtype),
        ),
        in_specs=[
            pl.BlockSpec((TB, K), lambda i: (i, 0)),              # x tile (f32)
            pl.BlockSpec((K, W_pad), lambda i: (0, 0)),           # fc_in weight
            pl.BlockSpec((1, W_pad), lambda i: (0, 0)),           # fc_in bias
            pl.BlockSpec((L, W_pad, W_pad), lambda i: (0, 0, 0)),  # hidden weights
            pl.BlockSpec((L, 1, W_pad), lambda i: (0, 0, 0)),      # hidden biases
            pl.BlockSpec((W_pad, C_pad), lambda i: (0, 0)),       # classifier weight
            pl.BlockSpec((1, C_pad), lambda i: (0, 0)),           # classifier bias
        ],
        out_specs=(
            pl.BlockSpec((TB, C_pad), lambda i: (i, 0)),          # logits tile
            pl.BlockSpec((TB, L * W_pad), lambda i: (i, 0)),      # hidden slab tile
        ),
        compiler_params=pltpu.CompilerParams(
            # Batch axis shards across the 2 TensorCores on v7x (nb >= 2
            # whenever the batch allows); plain sequential loop on v5e/v6e.
            dimension_semantics=("parallel",),
            # v5e's default scoped VMEM is only 16 MiB; raise it so the large
            # batch tiles fit, while leaving headroom under v7x's 64 MiB.
            vmem_limit_bytes=32 * 1024 * 1024,
        ),
    )(x_p, w_in_p, b_in_p, w_hid_p, b_hid_p, w_out_p, b_out_p)

    logits = logits_p[:B, :num_classes]
    # The kernel stores activations in bf16 (halved writeback); return them in
    # f32 to match the original module's output dtype.
    acts = [hidden_p[:B, i * W_pad:i * W_pad + width].astype(jnp.float32)
            for i in range(L)]
    return logits, acts


# ---------------------------------------------------------------------------
# Pure-JAX reference mirroring the kernel's bf16-matmul / f32-accumulate math
# ---------------------------------------------------------------------------
def fnn_forward_reference(params, x, *, compute_dtype=jnp.bfloat16):
    B = x.shape[0]
    h = x.reshape(B, -1).astype(compute_dtype)

    def lin(h, w, b):
        y = jnp.dot(h, w.astype(compute_dtype),
                    preferred_element_type=jnp.float32)
        return y + b.astype(jnp.float32)

    acts = []
    w, b = params["fc_in"]
    h = jnp.maximum(lin(h, w, b), 0.0).astype(compute_dtype)
    for (w, b) in params["fcs"]:
        h = jnp.maximum(lin(h, w, b), 0.0).astype(compute_dtype)
        acts.append(h.astype(jnp.float32))
    w, b = params["fc_embeddings"]
    h = jnp.maximum(lin(h, w, b), 0.0).astype(compute_dtype)
    acts.append(h.astype(jnp.float32))
    w, b = params["fc_classifier"]
    return lin(h, w, b), acts


# ---------------------------------------------------------------------------
# Parameter init (matches nn.Linear default U(-1/sqrt(in), 1/sqrt(in)))
# ---------------------------------------------------------------------------
def init_linear_params(key, in_features, out_features, dtype=jnp.float32):
    kw, kb = jax.random.split(key)
    bound = 1.0 / math.sqrt(in_features)
    # stored transposed relative to torch: (in_features, out_features)
    w = jax.random.uniform(kw, (in_features, out_features), dtype,
                           minval=-bound, maxval=bound)
    b = jax.random.uniform(kb, (out_features,), dtype,
                           minval=-bound, maxval=bound)
    return w, b


def init_fnn_params(key, width, depth, num_classes):
    keys = jax.random.split(key, depth + 1)
    params = {}
    params["fc_in"] = init_linear_params(keys[0], 28 * 28, width)
    params["fcs"] = [
        init_linear_params(keys[1 + i], width, width) for i in range(depth - 2)
    ]
    params["fc_embeddings"] = init_linear_params(keys[depth - 1], width, width)
    params["fc_classifier"] = init_linear_params(keys[depth], width, num_classes)
    return params


if __name__ == "__main__":
    # args.width = 32, args.depth = 4 (=> 2 hidden fcs), args.num_classes = 10
    WIDTH, DEPTH, NUM_CLASSES = 32, 4, 10
    BATCH = 2

    key = jax.random.PRNGKey(0)
    kx, kp = jax.random.split(key)

    # MNIST-like input in NCHW, as the PyTorch module expects.
    x = jax.random.normal(kx, (BATCH, 1, 28, 28), jnp.float32)
    params = init_fnn_params(kp, WIDTH, DEPTH, NUM_CLASSES)

    fwd = jax.jit(lambda p, xx: fnn_forward_fused(
        p, xx, width=WIDTH, num_classes=NUM_CLASSES))
    logits, acts = fwd(params, x)
    jax.block_until_ready(logits)
    jax.block_until_ready(acts)

    # Shape checks (depth-2 hidden acts + 1 embedding act).
    assert logits.shape == (BATCH, NUM_CLASSES)
    assert len(acts) == DEPTH - 1
    assert all(h.shape == (BATCH, WIDTH) for h in acts)

    # Numeric check against a plain-JAX reference with matching numerics.
    ref_logits, ref_acts = jax.jit(fnn_forward_reference)(params, x)
    assert jnp.allclose(logits, ref_logits, atol=1e-2, rtol=1e-2)
    for a_k, a_r in zip(acts, ref_acts):
        assert jnp.allclose(a_k, a_r, atol=2e-2, rtol=2e-2)

    print("KERNEL_OK")
</pallas_src>

<mosaic_0001>
module attributes {stable_mosaic.version = 11 : i64} {
  func.func @_fnn_fused_kernel(%arg0: i32, %arg1: memref<8x784xf32, #tpu.memory_space<vmem>>, %arg2: memref<784x128xbf16, #tpu.memory_space<vmem>>, %arg3: memref<1x128xf32, #tpu.memory_space<vmem>>, %arg4: memref<3x128x128xbf16, #tpu.memory_space<vmem>>, %arg5: memref<3x1x128xf32, #tpu.memory_space<vmem>>, %arg6: memref<128x128xbf16, #tpu.memory_space<vmem>>, %arg7: memref<1x128xf32, #tpu.memory_space<vmem>>, %arg8: memref<8x128xf32, #tpu.memory_space<vmem>>, %arg9: memref<8x384xbf16, #tpu.memory_space<vmem>>) attributes {dimension_semantics = [#tpu.dimension_semantics<parallel>], iteration_bounds = array<i64: 1>, scalar_prefetch = 0 : i64, scratch_operands = 0 : i64, tpu.core_type = #tpu.core_type<tc>, window_params = [{transform_indices = @transform_0, window_bounds = array<i64: 8, 784>}, {pipeline_mode = #tpu.pipeline_mode<synchronous>, transform_indices = @transform_1, window_bounds = array<i64: 784, 128>}, {pipeline_mode = #tpu.pipeline_mode<synchronous>, transform_indices = @transform_2, window_bounds = array<i64: 1, 128>}, {pipeline_mode = #tpu.pipeline_mode<synchronous>, transform_indices = @transform_3, window_bounds = array<i64: 3, 128, 128>}, {pipeline_mode = #tpu.pipeline_mode<synchronous>, transform_indices = @transform_4, window_bounds = array<i64: 3, 1, 128>}, {pipeline_mode = #tpu.pipeline_mode<synchronous>, transform_indices = @transform_5, window_bounds = array<i64: 128, 128>}, {pipeline_mode = #tpu.pipeline_mode<synchronous>, transform_indices = @transform_6, window_bounds = array<i64: 1, 128>}, {transform_indices = @transform_7, window_bounds = array<i64: 8, 128>}, {transform_indices = @transform_8, window_bounds = array<i64: 8, 384>}]} {
    %c0 = arith.constant 0 : index
    %c0_0 = arith.constant 0 : index
    %0 = vector.load %arg1[%c0, %c0_0] : memref<8x784xf32, #tpu.memory_space<vmem>>, vector<8x784xf32>
    %1 = arith.truncf %0 : vector<8x784xf32> to vector<8x784xbf16>
    %c0_1 = arith.constant 0 : index
    %c0_2 = arith.constant 0 : index
    %2 = vector.load %arg2[%c0_1, %c0_2] : memref<784x128xbf16, #tpu.memory_space<vmem>>, vector<784x128xbf16>
    %cst = arith.constant dense<0.000000e+00> : vector<8x128xf32>
    %3 = tpu.matmul %1, %2, %cst {dimension_numbers = #tpu.dot_dimension_numbers<[1], [0], [0], [1], [0, 0, 1, 1], [], []>} : vector<8x784xbf16>, vector<784x128xbf16>, vector<8x128xf32> -> vector<8x128xf32>
    %c0_3 = arith.constant 0 : index
    %c0_4 = arith.constant 0 : index
    %4 = vector.load %arg3[%c0_3, %c0_4] : memref<1x128xf32, #tpu.memory_space<vmem>>, vector<1x128xf32>
    %5 = vector.broadcast %4 : vector<1x128xf32> to vector<8x128xf32>
    %6 = arith.addf %3, %5 : vector<8x128xf32>
    %cst_5 = arith.constant 0.000000e+00 : f32
    %7 = vector.broadcast %cst_5 : f32 to vector<8x128xf32>
    %8 = arith.maximumf %6, %7 : vector<8x128xf32>
    %9 = arith.truncf %8 : vector<8x128xf32> to vector<8x128xbf16>
    %c0_6 = arith.constant 0 : index
    %c0_7 = arith.constant 0 : index
    %c0_8 = arith.constant 0 : index
    %10 = vector.load %arg4[%c0_6, %c0_7, %c0_8] : memref<3x128x128xbf16, #tpu.memory_space<vmem>>, vector<1x128x128xbf16>
    %11 = vector.shape_cast %10 : vector<1x128x128xbf16> to vector<128x128xbf16>
    %cst_9 = arith.constant dense<0.000000e+00> : vector<8x128xf32>
    %12 = tpu.matmul %9, %11, %cst_9 {dimension_numbers = #tpu.dot_dimension_numbers<[1], [0], [0], [1], [0, 0, 1, 1], [], []>} : vector<8x128xbf16>, vector<128x128xbf16>, vector<8x128xf32> -> vector<8x128xf32>
    %c0_10 = arith.constant 0 : index
    %c0_11 = arith.constant 0 : index
    %c0_12 = arith.constant 0 : index
    %13 = vector.load %arg5[%c0_10, %c0_11, %c0_12] : memref<3x1x128xf32, #tpu.memory_space<vmem>>, vector<1x1x128xf32>
    %14 = vector.shape_cast %13 : vector<1x1x128xf32> to vector<1x128xf32>
    %15 = vector.broadcast %14 : vector<1x128xf32> to vector<8x128xf32>
    %16 = arith.addf %12, %15 : vector<8x128xf32>
    %cst_13 = arith.constant 0.000000e+00 : f32
    %17 = vector.broadcast %cst_13 : f32 to vector<8x128xf32>
    %18 = arith.maximumf %16, %17 : vector<8x128xf32>
    %19 = arith.truncf %18 : vector<8x128xf32> to vector<8x128xbf16>
    %c0_14 = arith.constant 0 : index
    %c0_15 = arith.constant 0 : index
    %20 = vector.load %arg9[%c0_14, %c0_15] : memref<8x384xbf16, #tpu.memory_space<vmem>>, vector<8x128xbf16>
    tpu.vector_store %arg9[%c0_14, %c0_15], %19 {strides = array<i32>} : memref<8x384xbf16, #tpu.memory_space<vmem>>, vector<8x128xbf16>,
    %c1 = arith.constant 1 : index
    %c0_16 = arith.constant 0 : index
    %c0_17 = arith.constant 0 : index
    %21 = vector.load %arg4[%c1, %c0_16, %c0_17] : memref<3x128x128xbf16, #tpu.memory_space<vmem>>, vector<1x128x128xbf16>
    %22 = vector.shape_cast %21 : vector<1x128x128xbf16> to vector<128x128xbf16>
    %cst_18 = arith.constant dense<0.000000e+00> : vector<8x128xf32>
    %23 = tpu.matmul %19, %22, %cst_18 {dimension_numbers = #tpu.dot_dimension_numbers<[1], [0], [0], [1], [0, 0, 1, 1], [], []>} : vector<8x128xbf16>, vector<128x128xbf16>, vector<8x128xf32> -> vector<8x128xf32>
    %c1_19 = arith.constant 1 : index
    %c0_20 = arith.constant 0 : index
    %c0_21 = arith.constant 0 : index
    %24 = vector.load %arg5[%c1_19, %c0_20, %c0_21] : memref<3x1x128xf32, #tpu.memory_space<vmem>>, vector<1x1x128xf32>
    %25 = vector.shape_cast %24 : vector<1x1x128xf32> to vector<1x128xf32>
    %26 = vector.broadcast %25 : vector<1x128xf32> to vector<8x128xf32>
    %27 = arith.addf %23, %26 : vector<8x128xf32>
    %cst_22 = arith.constant 0.000000e+00 : f32
    %28 = vector.broadcast %cst_22 : f32 to vector<8x128xf32>
    %29 = arith.maximumf %27, %28 : vector<8x128xf32>
    %30 = arith.truncf %29 : vector<8x128xf32> to vector<8x128xbf16>
    %c0_23 = arith.constant 0 : index
    %c128 = arith.constant 128 : index
    %31 = vector.load %arg9[%c0_23, %c128] : memref<8x384xbf16, #tpu.memory_space<vmem>>, vector<8x128xbf16>
    tpu.vector_store %arg9[%c0_23, %c128], %30 {strides = array<i32>} : memref<8x384xbf16, #tpu.memory_space<vmem>>, vector<8x128xbf16>,
    %c2 = arith.constant 2 : index
    %c0_24 = arith.constant 0 : index
    %c0_25 = arith.constant 0 : index
    %32 = vector.load %arg4[%c2, %c0_24, %c0_25] : memref<3x128x128xbf16, #tpu.memory_space<vmem>>, vector<1x128x128xbf16>
    %33 = vector.shape_cast %32 : vector<1x128x128xbf16> to vector<128x128xbf16>
    %cst_26 = arith.constant dense<0.000000e+00> : vector<8x128xf32>
    %34 = tpu.matmul %30, %33, %cst_26 {dimension_numbers = #tpu.dot_dimension_numbers<[1], [0], [0], [1], [0, 0, 1, 1], [], []>} : vector<8x128xbf16>, vector<128x128xbf16>, vector<8x128xf32> -> vector<8x128xf32>
    %c2_27 = arith.constant 2 : index
    %c0_28 = arith.constant 0 : index
    %c0_29 = arith.constant 0 : index
    %35 = vector.load %arg5[%c2_27, %c0_28, %c0_29] : memref<3x1x128xf32, #tpu.memory_space<vmem>>, vector<1x1x128xf32>
    %36 = vector.shape_cast %35 : vector<1x1x128xf32> to vector<1x128xf32>
    %37 = vector.broadcast %36 : vector<1x128xf32> to vector<8x128xf32>
    %38 = arith.addf %34, %37 : vector<8x128xf32>
    %cst_30 = arith.constant 0.000000e+00 : f32
    %39 = vector.broadcast %cst_30 : f32 to vector<8x128xf32>
    %40 = arith.maximumf %38, %39 : vector<8x128xf32>
    %41 = arith.truncf %40 : vector<8x128xf32> to vector<8x128xbf16>
    %c0_31 = arith.constant 0 : index
    %c256 = arith.constant 256 : index
    %42 = vector.load %arg9[%c0_31, %c256] : memref<8x384xbf16, #tpu.memory_space<vmem>>, vector<8x128xbf16>
    tpu.vector_store %arg9[%c0_31, %c256], %41 {strides = array<i32>} : memref<8x384xbf16, #tpu.memory_space<vmem>>, vector<8x128xbf16>,
    %c0_32 = arith.constant 0 : index
    %c0_33 = arith.constant 0 : index
    %43 = vector.load %arg6[%c0_32, %c0_33] : memref<128x128xbf16, #tpu.memory_space<vmem>>, vector<128x128xbf16>
    %cst_34 = arith.constant dense<0.000000e+00> : vector<8x128xf32>
    %44 = tpu.matmul %41, %43, %cst_34 {dimension_numbers = #tpu.dot_dimension_numbers<[1], [0], [0], [1], [0, 0, 1, 1], [], []>} : vector<8x128xbf16>, vector<128x128xbf16>, vector<8x128xf32> -> vector<8x128xf32>
    %c0_35 = arith.constant 0 : index
    %c0_36 = arith.constant 0 : index
    %45 = vector.load %arg7[%c0_35, %c0_36] : memref<1x128xf32, #tpu.memory_space<vmem>>, vector<1x128xf32>
    %46 = vector.broadcast %45 : vector<1x128xf32> to vector<8x128xf32>
    %47 = arith.addf %44, %46 : vector<8x128xf32>
    %c0_37 = arith.constant 0 : index
    %c0_38 = arith.constant 0 : index
    %48 = vector.load %arg8[%c0_37, %c0_38] : memref<8x128xf32, #tpu.memory_space<vmem>>, vector<8x128xf32>
    tpu.vector_store %arg8[%c0_37, %c0_38], %47 {strides = array<i32>} : memref<8x128xf32, #tpu.memory_space<vmem>>, vector<8x128xf32>,
    return
  }
  func.func @transform_0(%arg0: i32) -> (i32, i32) {
    %c0_i32 = arith.constant 0 : i32
    %c0_i32_0 = arith.constant 0 : i32
    return %arg0, %c0_i32 : i32, i32
  }
  func.func @transform_1(%arg0: i32) -> (i32, i32) {
    %c0_i32 = arith.constant 0 : i32
    %c0_i32_0 = arith.constant 0 : i32
    %c0_i32_1 = arith.constant 0 : i32
    return %c0_i32, %c0_i32_0 : i32, i32
  }
  func.func @transform_2(%arg0: i32) -> (i32, i32) {
    %c0_i32 = arith.constant 0 : i32
    %c0_i32_0 = arith.constant 0 : i32
    %c0_i32_1 = arith.constant 0 : i32
    return %c0_i32, %c0_i32_0 : i32, i32
  }
  func.func @transform_3(%arg0: i32) -> (i32, i32, i32) {
    %c0_i32 = arith.constant 0 : i32
    %c0_i32_0 = arith.constant 0 : i32
    %c0_i32_1 = arith.constant 0 : i32
    %c0_i32_2 = arith.constant 0 : i32
    return %c0_i32, %c0_i32_0, %c0_i32_1 : i32, i32, i32
  }
  func.func @transform_4(%arg0: i32) -> (i32, i32, i32) {
    %c0_i32 = arith.constant 0 : i32
    %c0_i32_0 = arith.constant 0 : i32
    %c0_i32_1 = arith.constant 0 : i32
    %c0_i32_2 = arith.constant 0 : i32
    return %c0_i32, %c0_i32_0, %c0_i32_1 : i32, i32, i32
  }
  func.func @transform_5(%arg0: i32) -> (i32, i32) {
    %c0_i32 = arith.constant 0 : i32
    %c0_i32_0 = arith.constant 0 : i32
    %c0_i32_1 = arith.constant 0 : i32
    return %c0_i32, %c0_i32_0 : i32, i32
  }
  func.func @transform_6(%arg0: i32) -> (i32, i32) {
    %c0_i32 = arith.constant 0 : i32
    %c0_i32_0 = arith.constant 0 : i32
    %c0_i32_1 = arith.constant 0 : i32
    return %c0_i32, %c0_i32_0 : i32, i32
  }
  func.func @transform_7(%arg0: i32) -> (i32, i32) {
    %c0_i32 = arith.constant 0 : i32
    %c0_i32_0 = arith.constant 0 : i32
    return %arg0, %c0_i32 : i32, i32
  }
  func.func @transform_8(%arg0: i32) -> (i32, i32) {
    %c0_i32 = arith.constant 0 : i32
    %c0_i32_0 = arith.constant 0 : i32
    return %arg0, %c0_i32 : i32, i32
  }
}

</mosaic_0001>

<bundles_post_ra>
// kernel: _lambda_.1
= control target key start
LH: loop header
LB: loop body
LE: loop exit
PB: predicated region body
PF: predicated region fallthrough
CT: control target
= control target key end

     0   :  { %v1468_v44 = vmov 0.0   ;;  %vm1469_vm0 = vmmov 0   ;;  %vm442_vm1 = vcmask 130048   ;;  %s1849_s1 = inlined_call_operand.vmem [shape: bf16[784,128], index: 1, kind: input, shape index: {}]   ;;  %s1850_s0 = inlined_call_operand.vmem [shape: f32[8,784], index: 0, kind: input, shape index: {}]   ;;  %s1851_s3 = inlined_call_operand.vmem [shape: bf16[3,128,128], index: 3, kind: input, shape index: {}]   ;;  %s1852_s2 = inlined_call_operand.vmem [shape: f32[1,128], index: 2, kind: input, shape index: {}]   ;;  %s1853_s4 = inlined_call_operand.vmem [shape: f32[3,1,128], index: 4, kind: input, shape index: {}]   ;;  %s1854_s8 = inlined_call_operand.vmem [shape: bf16[8,384], index: 8, kind: output, shape index: {1}]   ;;  %s1855_s5 = inlined_call_operand.vmem [shape: bf16[128,128], index: 5, kind: input, shape index: {}]   ;;  %s1856_s6 = inlined_call_operand.vmem [shape: f32[1,128], index: 6, kind: input, shape index: {}]   ;;  %s1857_s7 = inlined_call_operand.vmem [shape: f32[8,128], index: 7, kind: output, shape index: {0}]  }
   0x1   :  { %v1387_v0 = vld [vmem:[%s1849_s1 + $0x40] sm:$0xff]   ;;  %v1391_v4 = vld [vmem:[%s1849_s1 + $0x48] sm:$0xff]   ;;  %v1395_v8 = vld [vmem:[%s1849_s1 + $0x50] sm:$0xff]  }
   0x2   :  { %v1388_v1 = vld [vmem:[%s1849_s1] sm:$0xff]   ;;  %1195 = vmatprep.subr.bf16.mxu0 %v1387_v0  ;;  %v1392_v5 = vld [vmem:[%s1849_s1 + $0x8] sm:$0xff]   ;;  %v1396_v9 = vld [vmem:[%s1849_s1 + $0x10] sm:$0xff]  }
   0x3   :  { %v1389_v2 = vld [vmem:[%s1849_s1 + $0xc0] sm:$0xff]   ;;  %1196 = vmatpush3.bf16.msra.mxu0 %v1388_v1  ;;  %v1393_v6 = vld [vmem:[%s1849_s1 + $0xc8] sm:$0xff]   ;;  %v1397_v10 = vld [vmem:[%s1849_s1 + $0xd0] sm:$0xff]  }
   0x4   :  { %v1390_v3 = vld [vmem:[%s1849_s1 + $0x80] sm:$0xff]   ;;  %1217 = vmatprep.subr.bf16.mxu1 %v1389_v2  ;;  %1197 = vmatprep.subr.bf16.mxu0 %v1391_v4  ;;  %v1394_v7 = vld [vmem:[%s1849_s1 + $0x88] sm:$0xff]   ;;  %v1398_v11 = vld [vmem:[%s1849_s1 + $0x90] sm:$0xff]  }
   0x5   :  { %1218 = vmatpush3.bf16.msra.mxu1 %v1390_v3  ;;  %v1399_v12 = vld [vmem:[%s1849_s1 + $0x58] sm:$0xff]   ;;  %v1403_v16 = vld [vmem:[%s1849_s1 + $0x60] sm:$0xff]   ;;  %v1407_v20 = vld [vmem:[%s1849_s1 + $0x68] sm:$0xff]  }
   0x6   :  { %1219 = vmatprep.subr.bf16.mxu1 %v1393_v6  ;;  %v1400_v13 = vld [vmem:[%s1849_s1 + $0x18] sm:$0xff]   ;;  %v1404_v17 = vld [vmem:[%s1849_s1 + $0x20] sm:$0xff]   ;;  %v1408_v21 = vld [vmem:[%s1849_s1 + $0x28] sm:$0xff]  }
   0x7   :  { %1198 = vmatpush3.bf16.msra.mxu0 %v1392_v5  ;;  %v1401_v14 = vld [vmem:[%s1849_s1 + $0xd8] sm:$0xff]   ;;  %v1405_v18 = vld [vmem:[%s1849_s1 + $0xe0] sm:$0xff]   ;;  %v1409_v22 = vld [vmem:[%s1849_s1 + $0xe8] sm:$0xff]  }
   0x8   :  { %1199 = vmatprep.subr.bf16.mxu0 %v1395_v8  ;;  %v1402_v15 = vld [vmem:[%s1849_s1 + $0x98] sm:$0xff]   ;;  %v1406_v19 = vld [vmem:[%s1849_s1 + $0xa0] sm:$0xff]   ;;  %v1410_v23 = vld [vmem:[%s1849_s1 + $0xa8] sm:$0xff]  }
   0x9   :  { %1220 = vmatpush3.bf16.msra.mxu1 %v1394_v7  ;;  %v1411_v24 = vld [vmem:[%s1849_s1 + $0x70] sm:$0xff]   ;;  %v1415_v28 = vld [vmem:[%s1849_s1 + $0x78] sm:$0xff]   ;;  %v30_v31 = vld [vmem:[%s1850_s0 + $0x8] sm:$0xff] }
   0xa   :  { %1221 = vmatprep.subr.bf16.mxu1 %v1397_v10  ;;  %v1412_v25 = vld [vmem:[%s1849_s1 + $0x30] sm:$0xff]   ;;  %v1416_v29 = vld [vmem:[%s1849_s1 + $0x38] sm:$0xff]   ;;  %v37_v32 = vpack.c.bf16 %v30_v31, %v30_v31  ;;  %v29_v34 = vld [vmem:[%s1850_s0] sm:$0xff] }
   0xb   :  { %1200 = vmatpush3.bf16.msra.mxu0 %v1396_v9  ;;  %v1413_v26 = vld [vmem:[%s1849_s1 + $0xf0] sm:$0xff]   ;;  %v1417_v30 = vld [vmem:[%s1849_s1 + $0xf8] sm:$0xff]   ;;  %v36_v35 = vpack.c.bf16 %v29_v34, %v29_v34  ;;  %v1419_v36 = vld [vmem:[%s1849_s1 + $0x140] sm:$0xff]  }
   0xc   :  { %1201 = vmatprep.subr.bf16.mxu0 %v1399_v12  ;;  %v1414_v27 = vld [vmem:[%s1849_s1 + $0xb0] sm:$0xff]   ;;  %v1418_v33 = vld [vmem:[%s1849_s1 + $0xb8] sm:$0xff]   ;;  %478 = vmatprep.mubr.bf16.mxu0 %v37_v32  ;;  %v1420_v39 = vld [vmem:[%s1849_s1 + $0x100] sm:$0xff]  }
   0xd   :  { %1222 = vmatpush3.bf16.msra.mxu1 %v1398_v11  ;;  %v32_v37 = vld [vmem:[%s1850_s0 + $0x18] sm:$0xff]  ;;  %v31_v40 = vld [vmem:[%s1850_s0 + $0x10] sm:$0xff]  ;;  %v1421_v42 = vld [vmem:[%s1849_s1 + $0x148] sm:$0xff]  }
   0xe   :  { %1223 = vmatprep.subr.bf16.mxu1 %v1401_v14  ;;  %v39_v38 = vpack.c.bf16 %v32_v37, %v32_v37  ;;  %v38_v41 = vpack.c.bf16 %v31_v40, %v31_v40  ;;  %v1422_v43 = vld [vmem:[%s1849_s1 + $0x108] sm:$0xff]   ;;  %v1423_v45 = vld [vmem:[%s1849_s1 + $0x150] sm:$0xff]   ;;  %v1425_v47 = vld [vmem:[%s1849_s1 + $0x158] sm:$0xff]  }
   0xf   :  { %1202 = vmatpush3.bf16.msra.mxu0 %v1400_v13  ;;  %v1424_v46 = vld [vmem:[%s1849_s1 + $0x110] sm:$0xff]   ;;  %v1426_v48 = vld [vmem:[%s1849_s1 + $0x118] sm:$0xff]   ;;  %v1427_v49 = vld [vmem:[%s1849_s1 + $0x160] sm:$0xff]  }
  0x10   :  { %1203 = vmatprep.subr.bf16.mxu0 %v1403_v16  ;;  %518 = vmatprep.mubr.bf16.mxu1 %v39_v38  ;;  %v1428_v50 = vld [vmem:[%s1849_s1 + $0x120] sm:$0xff]   ;;  %v1429_v51 = vld [vmem:[%s1849_s1 + $0x168] sm:$0xff]   ;;  %v35_v55 = vld [vmem:[%s1850_s0 + $0x30] sm:$0xff] }
  0x11   :  { %1224 = vmatpush3.bf16.msra.mxu1 %v1402_v15  ;;  %v1435_v52 = vld [vmem:[%s1849_s1 + $0x180] sm:$0xff]   ;;  %v34_v53 = vld [vmem:[%s1850_s0 + $0x28] sm:$0xff]  ;;  %v42_v57 = vpack.c.bf16 %v35_v55, %v35_v55  ;;  %v1431_v58 = vld [vmem:[%s1849_s1 + $0x170] sm:$0xff]  }
  0x12   :  { %1225 = vmatprep.subr.bf16.mxu1 %v1405_v18  ;;  %v41_v54 = vpack.c.bf16 %v34_v53, %v34_v53  ;;  %v1430_v56 = vld [vmem:[%s1849_s1 + $0x128] sm:$0xff]   ;;  %v1432_v59 = vld [vmem:[%s1849_s1 + $0x130] sm:$0xff]   ;;  %v1433_v60 = vld [vmem:[%s1849_s1 + $0x178] sm:$0xff]  }
  0x13   :  { %1204 = vmatpush3.bf16.msra.mxu0 %v1404_v17  ;;  %v1434_v61 = vld [vmem:[%s1849_s1 + $0x138] sm:$0xff]   ;;  %v33_v62 = vld [vmem:[%s1850_s0 + $0x20] sm:$0xff]  ;;  %v1437_v1 = vld [vmem:[%s1851_s3 + $0x8] sm:$0xff]  }
  0x14   :  { %1205 = vmatprep.subr.bf16.mxu0 %v1407_v20  ;;  %v40_v63 = vpack.c.bf16 %v33_v62, %v33_v62  ;;  %v1436_v0 = vld [vmem:[%s1851_s3] sm:$0xff]   ;;  %v1438_v2 = vld [vmem:[%s1851_s3 + $0x10] sm:$0xff]   ;;  %v1439_v3 = vld [vmem:[%s1851_s3 + $0x18] sm:$0xff]  }
  0x15   :  { %1226 = vmatpush3.bf16.msra.mxu1 %v1406_v19  ;;  %v1440_v4 = vld [vmem:[%s1851_s3 + $0x20] sm:$0xff]   ;;  %v1441_v5 = vld [vmem:[%s1851_s3 + $0x28] sm:$0xff]   ;;  %v1442_v6 = vld [vmem:[%s1851_s3 + $0x30] sm:$0xff]  }
  0x16   :  { %1227 = vmatprep.subr.bf16.mxu1 %v1409_v22  ;;  %v1443_v7 = vld [vmem:[%s1851_s3 + $0x38] sm:$0xff]   ;;  %v1444_v8 = vld [vmem:[%s1851_s3 + $0x40] sm:$0xff]   ;;  %v1445_v9 = vld [vmem:[%s1851_s3 + $0x48] sm:$0xff]  }
  0x17   :  { %1206 = vmatpush3.bf16.msra.mxu0 %v1408_v21  ;;  %v1446_v10 = vld [vmem:[%s1851_s3 + $0x50] sm:$0xff]   ;;  %v1447_v11 = vld [vmem:[%s1851_s3 + $0x58] sm:$0xff]   ;;  %v1448_v12 = vld [vmem:[%s1851_s3 + $0x60] sm:$0xff]  }
  0x18   :  { %1207 = vmatprep.subr.bf16.mxu0 %v1411_v24  ;;  %v1449_v13 = vld [vmem:[%s1851_s3 + $0x68] sm:$0xff]   ;;  %v1074_v15 = vld [vmem:[%s1852_s2] ss:$0 sm:$0xff]  ;;  %v1450_v40 = vld [vmem:[%s1851_s3 + $0x70] sm:$0xff]  }
  0x19   :  { %1228 = vmatpush3.bf16.msra.mxu1 %v1410_v23  ;;  %v1463_v62 = vld [vmem:[%s1855_s5 + $0x18] sm:$0xff]  }
  0x1a   :  { %1229 = vmatprep.subr.bf16.mxu1 %v1413_v26 }
  0x1b   :  { %1208 = vmatpush3.bf16.msra.mxu0 %v1412_v25 }
  0x1c   :  { %1209 = vmatprep.subr.bf16.mxu0 %v1415_v28 }
  0x1d   :  { %1230 = vmatpush3.bf16.msra.mxu1 %v1414_v27 }
  0x1e   :  { %1231 = vmatprep.subr.bf16.mxu1 %v1417_v30 }
  0x1f   :  { %1210 = vmatpush3.bf16.msra.mxu0 %v1416_v29 }
  0x20   :  { %1239 = vmatprep.subr.bf16.mxu0 %v1419_v36 }
  0x21   :  { %1232 = vmatpush3.bf16.msra.mxu1 %v1418_v33 }
  0x22   :  { %479 = vmatmul.mubr.bf16.vlgmr.msra.gmra.mrb[0].mxu0 %v36_v35  ;;  %1299 = vmatprep.subr.bf16.mxu1 %v1468_v44 }
  0x23   :  { %1240 = vmatpush3.bf16.msra.mxu0 %v1420_v39  ;;  %558 = vmatprep.mubr.bf16.mxu0 %v41_v54 }
  0x24   :  { %519 = vmatmul.mubr.bf16.vlgmr.msra.gmra.mrb[0].mxu1 %v38_v41  ;;  %1241 = vmatprep.subr.bf16.mxu0 %v1421_v42  ;;  %v1451_v41 = vld [vmem:[%s1851_s3 + $0x78] sm:$0xff]   ;;  %v1452_v42 = vld [vmem:[%s1851_s3 + $0x80] sm:$0xff]  }
  0x25   :  { %1301 = vmatprep.mubr.msk.bf16.mxu1 %vm1469_vm0, %v1468_v44  ;;  %1300 = vmatpush3.bf16.msra.mxu1 %v1435_v52 }
  0x26   :  { %1305 = vmatprep.subr.bf16.mxu1 %v1468_v44 }
  0x27   :  { %1242 = vmatpush3.bf16.msra.mxu0 %v1422_v43  ;;  %v1453_v43 = vld [vmem:[%s1851_s3 + $0x88] sm:$0xff]  }
  0x28   :  { %1243 = vmatprep.subr.bf16.mxu0 %v1423_v45  ;;  %v1454_v45 = vld [vmem:[%s1851_s3 + $0x90] sm:$0xff]  }
  0x2b   :  { %1244 = vmatpush3.bf16.msra.mxu0 %v1424_v46  ;;  %v1455_v46 = vld [vmem:[%s1851_s3 + $0x98] sm:$0xff]  }
  0x2c   :  { %1245 = vmatprep.subr.bf16.mxu0 %v1425_v47  ;;  %1302 = vmatmul.mubr.msk.bf16.vlgmr.msra.gmra.mrb[4].mxu1 %vm442_vm1, %v42_v57  ;;  %v1456_v47 = vld [vmem:[%s1851_s3 + $0xa0] sm:$0xff]   ;;  %v1458_v57 = vld [vmem:[%s1851_s3 + $0xb0] sm:$0xff]  }
  0x2d   :  { %1321 = vmatprep.mubr.msk.bf16.mxu1 %vm1469_vm0, %v1468_v44  ;;  %1306 = vmatpush3.bf16.msra.mxu1 %v1436_v0  ;;  %v1465_v0 = vld [vmem:[%s1855_s5 + $0x28] sm:$0xff]  }
  0x2e   :  { %1307 = vmatprep.subr.bf16.mxu1 %v1468_v44 }
  0x2f   :  { %1246 = vmatpush3.bf16.msra.mxu0 %v1426_v48  ;;  %v1457_v48 = vld [vmem:[%s1851_s3 + $0xa8] sm:$0xff]  }
  0x30   :  { %1247 = vmatprep.subr.bf16.mxu0 %v1427_v49  ;;  %v1125_v49 = vld [vmem:[%s1853_s4] ss:$0 sm:$0xff] }
  0x31   :  { %1308 = vmatpush3.bf16.msra.mxu1 %v1437_v1  ;;  %v1151_v1 = vld [vmem:[%s1853_s4 + $0x1] ss:$0 sm:$0xff] }
  0x32   :  { %1309 = vmatprep.subr.bf16.mxu1 %v1468_v44 }
  0x33   :  { %1248 = vmatpush3.bf16.msra.mxu0 %v1428_v50 }
  0x34   :  { %1249 = vmatprep.subr.bf16.mxu0 %v1429_v51 }
  0x35   :  { %1310 = vmatpush3.bf16.msra.mxu1 %v1438_v2 }
  0x36   :  { %1311 = vmatprep.subr.bf16.mxu1 %v1468_v44 }
  0x37   :  { %1250 = vmatpush3.bf16.msra.mxu0 %v1430_v56 }
  0x38   :  { %1251 = vmatprep.subr.bf16.mxu0 %v1431_v58  ;;  %v1459_v58 = vld [vmem:[%s1851_s3 + $0xb8] sm:$0xff]  }
  0x39   :  { %1312 = vmatpush3.bf16.msra.mxu1 %v1439_v3 }
  0x3a   :  { %1313 = vmatprep.subr.bf16.mxu1 %v1468_v44 }
  0x3b   :  { %1252 = vmatpush3.bf16.msra.mxu0 %v1432_v59  ;;  %v1460_v59 = vld [vmem:[%s1855_s5] sm:$0xff]  }
  0x3c   :  { %1253 = vmatprep.subr.bf16.mxu0 %v1433_v60  ;;  %v1461_v60 = vld [vmem:[%s1855_s5 + $0x8] sm:$0xff]  }
  0x3d   :  { %1314 = vmatpush3.bf16.msra.mxu1 %v1440_v4 }
  0x3e   :  { %1315 = vmatprep.subr.bf16.mxu1 %v1468_v44 }
  0x3f   :  { %1254 = vmatpush3.bf16.msra.mxu0 %v1434_v61  ;;  %v1462_v61 = vld [vmem:[%s1855_s5 + $0x10] sm:$0xff]  }
  0x40   :  { %1325 = vmatprep.subr.bf16.mxu0 %v1468_v44 }
  0x41   :  { %1316 = vmatpush3.bf16.msra.mxu1 %v1441_v5 }
  0x42   :  { %559 = vmatmul.mubr.bf16.vlgmr.msra.gmra.mrb[4].mxu0 %v40_v63  ;;  %1317 = vmatprep.subr.bf16.mxu1 %v1468_v44  ;;  %v1464_v63 = vld [vmem:[%s1855_s5 + $0x20] sm:$0xff]  }
  0x43   :  { %1341 = vmatprep.mubr.msk.bf16.mxu0 %vm1469_vm0, %v1468_v44  ;;  %1326 = vmatpush3.bf16.msra.mxu0 %v1444_v8 }
  0x44   :  { %1327 = vmatprep.subr.bf16.mxu0 %v1468_v44 }
  0x45   :  { %1318 = vmatpush3.bf16.msra.mxu1 %v1442_v6 }
  0x46   :  { %1319 = vmatprep.subr.bf16.mxu1 %v1468_v44 }
  0x47   :  { %1328 = vmatpush3.bf16.msra.mxu0 %v1445_v9  ;;  %v1466_v9 = vld [vmem:[%s1855_s5 + $0x30] sm:$0xff]  }
  0x48   :  { %1329 = vmatprep.subr.bf16.mxu0 %v1468_v44 }
  0x49   :  { %1320 = vmatpush3.bf16.msra.mxu1 %v1443_v7 }
  0x4a   :  { %1345 = vmatprep.subr.bf16.mxu1 %v1468_v44 }
  0x4b   :  { %1330 = vmatpush3.bf16.msra.mxu0 %v1446_v10  ;;  %v1467_v10 = vld [vmem:[%s1855_s5 + $0x38] sm:$0xff]  }
  0x4c   :  { %1331 = vmatprep.subr.bf16.mxu0 %v1468_v44 }
  0x4f   :  { %1332 = vmatpush3.bf16.msra.mxu0 %v1447_v11  ;;  %v1177_v11 = vld [vmem:[%s1853_s4 + $0x2] ss:$0 sm:$0xff] }
  0x50   :  { %1333 = vmatprep.subr.bf16.mxu0 %v1468_v44 }
  0x53   :  { %1334 = vmatpush3.bf16.msra.mxu0 %v1448_v12 }
  0x54   :  { %1335 = vmatprep.subr.bf16.mxu0 %v1468_v44 }
  0x57   :  { %1336 = vmatpush3.bf16.msra.mxu0 %v1449_v13 }
  0x58   :  { %1337 = vmatprep.subr.bf16.mxu0 %v1468_v44 }
  0x5b   :  { %1338 = vmatpush3.bf16.msra.mxu0 %v1450_v40 }
  0x5c   :  { %1339 = vmatprep.subr.bf16.mxu0 %v1468_v44 }
  0x5f   :  { %1340 = vmatpush3.bf16.msra.mxu0 %v1451_v41 }
  0x60   :  { %1365 = vmatprep.subr.bf16.mxu0 %v1468_v44 }
  0xf5   :  { %v1211_v14 = vpop.f32.mrb[0].mxu0 }
  0xf6   :  { %v1212_v16 = vpop.f32.mrb[1].mxu0 }
  0xf7   :  { %v1213_v17 = vadd.f32 %v1212_v16, %v1211_v14  ;;  %v1214_v18 = vpop.f32.mrb[2].mxu0  ;;  %v1233_v19 = vpop.f32.mrb[0].mxu1 }
  0xf8   :  { %v1215_v20 = vpop.f32.mrb[3].mxu0  ;;  %v1234_v22 = vpop.f32.mrb[1].mxu1 }
  0xf9   :  { %v481_v21 = vadd.f32 %v1213_v17, %v1074_v15  ;;  %v1235_v23 = vadd.f32 %v1234_v22, %v1233_v19  ;;  %v1236_v24 = vpop.f32.mrb[2].mxu1 }
  0xfa   :  { %v1237_v25 = vpop.f32.mrb[3].mxu1 }
  0xfb   :  { %v521_v26 = vadd.f32 %v1235_v23, %v481_v21 }
  0xff   :  { %v600_v27 = vpop.f32.mrb[4].mxu1 }
 0x100   :  { %v1303_v28 = vpop.f32.mrb[5].mxu1 }
 0x101   :  { %v603_v29 = vpop.f32.mrb[6].mxu1 }
 0x102   :  { %v1304_v30 = vpop.f32.mrb[7].mxu1 }
 0x115   :  { %v1255_v31 = vpop.f32.mrb[4].mxu0 }
 0x116   :  { %v1256_v32 = vpop.f32.mrb[5].mxu0 }
 0x117   :  { %v1257_v33 = vadd.f32 %v1256_v32, %v1255_v31  ;;  %v1258_v34 = vpop.f32.mrb[6].mxu0 }
 0x118   :  { %v1259_v35 = vpop.f32.mrb[7].mxu0 }
 0x119   :  { %v561_v36 = vadd.f32 %v1257_v33, %v521_v26 }
 0x11b   :  { %v601_v37 = vadd.f32 %v600_v27, %v561_v36 }
 0x11d   :  { %v606_v38 = vmax.f32 %v601_v37, 0.0 }
 0x11f   :  { %v607_v39 = vpack.c.bf16 %v606_v38, %v606_v38 }
 0x121   :  { %1322 = vmatmul.mubr.bf16.vlgmr.msra.gmra.mrb[8].mxu1 %v607_v39 }
 0x122   :  { %1361 = vmatprep.mubr.msk.bf16.mxu1 %vm1469_vm0, %v1468_v44  ;;  %1346 = vmatpush3.bf16.msra.mxu1 %v1452_v42 }
 0x123   :  { %1347 = vmatprep.subr.bf16.mxu1 %v1468_v44 }
 0x126   :  { %1348 = vmatpush3.bf16.msra.mxu1 %v1453_v43 }
 0x127   :  { %1349 = vmatprep.subr.bf16.mxu1 %v1468_v44 }
 0x12a   :  { %1350 = vmatpush3.bf16.msra.mxu1 %v1454_v45 }
 0x12b   :  { %1351 = vmatprep.subr.bf16.mxu1 %v1468_v44 }
 0x12e   :  { %1352 = vmatpush3.bf16.msra.mxu1 %v1455_v46 }
 0x12f   :  { %1353 = vmatprep.subr.bf16.mxu1 %v1468_v44 }
 0x132   :  { %1354 = vmatpush3.bf16.msra.mxu1 %v1456_v47 }
 0x133   :  { %1355 = vmatprep.subr.bf16.mxu1 %v1468_v44 }
 0x136   :  { %1356 = vmatpush3.bf16.msra.mxu1 %v1457_v48 }
 0x137   :  { %1357 = vmatprep.subr.bf16.mxu1 %v1468_v44 }
 0x13a   :  { %1358 = vmatpush3.bf16.msra.mxu1 %v1458_v57 }
 0x13b   :  { %1359 = vmatprep.subr.bf16.mxu1 %v1468_v44 }
 0x13e   :  { %1360 = vmatpush3.bf16.msra.mxu1 %v1459_v58 }
 0x1f4   :  { %v713_v50 = vpop.f32.mrb[8].mxu1 }
 0x1f5   :  { %v714_v51 = vadd.f32 %v1125_v49, %v713_v50  ;;  %v1323_v52 = vpop.f32.mrb[9].mxu1 }
 0x1f6   :  { %v716_v53 = vpop.f32.mrb[10].mxu1 }
 0x1f7   :  { %v719_v54 = vmax.f32 %v714_v51, 0.0  ;;  %v1324_v55 = vpop.f32.mrb[11].mxu1 }
 0x1f9   :  { %v720_v56 = vpack.c.bf16 %v719_v54, %v719_v54 }
 0x1fb   :  { %721 = vst [vmem:[%s1854_s8] sm:$0xf] %v720_v56  ;;  %1342 = vmatmul.mubr.bf16.vlgmr.msra.gmra.mrb[8].mxu0 %v720_v56 }
 0x1fc   :  { %1381 = vmatprep.mubr.msk.bf16.mxu0 %vm1469_vm0, %v1468_v44  ;;  %1366 = vmatpush3.bf16.msra.mxu0 %v1460_v59 }
 0x1fd   :  { %1367 = vmatprep.subr.bf16.mxu0 %v1468_v44 }
 0x200   :  { %1368 = vmatpush3.bf16.msra.mxu0 %v1461_v60 }
 0x201   :  { %1369 = vmatprep.subr.bf16.mxu0 %v1468_v44 }
 0x204   :  { %1370 = vmatpush3.bf16.msra.mxu0 %v1462_v61 }
 0x205   :  { %1371 = vmatprep.subr.bf16.mxu0 %v1468_v44 }
 0x208   :  { %1372 = vmatpush3.bf16.msra.mxu0 %v1463_v62 }
 0x209   :  { %1373 = vmatprep.subr.bf16.mxu0 %v1468_v44 }
 0x20c   :  { %1374 = vmatpush3.bf16.msra.mxu0 %v1464_v63 }
 0x20d   :  { %1375 = vmatprep.subr.bf16.mxu0 %v1468_v44 }
 0x210   :  { %1376 = vmatpush3.bf16.msra.mxu0 %v1465_v0 }
 0x211   :  { %1377 = vmatprep.subr.bf16.mxu0 %v1468_v44 }
 0x214   :  { %1378 = vmatpush3.bf16.msra.mxu0 %v1466_v9 }
 0x215   :  { %1379 = vmatprep.subr.bf16.mxu0 %v1468_v44  ;;  %v1186_v44 = vld [vmem:[%s1856_s6] ss:$0 sm:$0xff] }
 0x218   :  { %1380 = vmatpush3.bf16.msra.mxu0 %v1467_v10 }
 0x2ce   :  { %v829_v2 = vpop.f32.mrb[8].mxu0 }
 0x2cf   :  { %v830_v3 = vadd.f32 %v1151_v1, %v829_v2  ;;  %v1343_v4 = vpop.f32.mrb[9].mxu0 }
 0x2d0   :  { %v832_v5 = vpop.f32.mrb[10].mxu0 }
 0x2d1   :  { %v835_v6 = vmax.f32 %v830_v3, 0.0  ;;  %v1344_v7 = vpop.f32.mrb[11].mxu0 }
 0x2d3   :  { %v836_v8 = vpack.c.bf16 %v835_v6, %v835_v6 }
 0x2d5   :  { %837 = vst [vmem:[%s1854_s8 + $0x4] sm:$0xf] %v836_v8  ;;  %1362 = vmatmul.mubr.bf16.vlgmr.msra.gmra.mrb[12].mxu1 %v836_v8 }
 0x3a8   :  { %v945_v12 = vpop.f32.mrb[12].mxu1 }
 0x3a9   :  { %v946_v13 = vadd.f32 %v1177_v11, %v945_v12  ;;  %v1363_v14 = vpop.f32.mrb[13].mxu1 }
 0x3aa   :  { %v948_v15 = vpop.f32.mrb[14].mxu1 }
 0x3ab   :  { %v951_v16 = vmax.f32 %v946_v13, 0.0  ;;  %v1364_v17 = vpop.f32.mrb[15].mxu1 }
 0x3ad   :  { %v952_v18 = vpack.c.bf16 %v951_v16, %v951_v16 }
 0x3af   :  { %953 = vst [vmem:[%s1854_s8 + $0x8] sm:$0xf] %v952_v18  ;;  %1382 = vmatmul.mubr.bf16.vlgmr.msra.gmra.mrb[12].mxu0 %v952_v18 }
 0x482   :  { %v1059_v19 = vpop.f32.mrb[12].mxu0 }
 0x483   :  { %v1060_v20 = vadd.f32 %v1186_v44, %v1059_v19  ;;  %v1383_v21 = vpop.f32.mrb[13].mxu0 }
 0x484   :  { %v1062_v22 = vpop.f32.mrb[14].mxu0 }
 0x485   :  { %1065 = vst [vmem:[%s1857_s7] sm:$0xff] %v1060_v20  ;;  %v1384_v23 = vpop.f32.mrb[15].mxu0 }

</bundles_post_ra>
